<compile_context>
chip_gen: v7x
topology: tpu7x:2x2x1
jax: 0.10.0
libtpu: 0.0.40
codegen_flags: <defaults>
</compile_context>

<pallas_src>
import functools

import jax
import jax.numpy as jnp
from jax.experimental import pallas as pl
from jax.experimental.pallas import tpu as pltpu

LANE = 128
MAX_ROW_TILE = 512  # rows per grid step; bounds VMEM and amortizes MXU fill


def _round_up(n, m=LANE):
    return ((n + m - 1) // m) * m


def _ffn_fused_kernel(x_ref, *refs, num_layers, out_dim, final_act):
    """Whole forward pass for one batch tile.

    refs = (w0, b0, w1, b1, ..., w_{L-1}, b_{L-1}, o_ref)
    w_i already transposed to [in, out] and lane-padded; b_i is [1, out_pad].
    """
    o_ref = refs[-1]
    wb = refs[:-1]

    h = x_ref[...]
    for i in range(num_layers):
        w = wb[2 * i][...]
        b = wb[2 * i + 1][...]
        y = jnp.dot(h, w, preferred_element_type=jnp.float32) + b
        if i < num_layers - 1:
            # hidden layer: ReLU; dropout is eval-mode identity.
            h = jnp.maximum(y, 0.0)
        else:
            h = y

    if final_act == "softmax":
        # Mask the zero-padded lanes so they don't pollute the denominator.
        lane_idx = jax.lax.broadcasted_iota(jnp.int32, h.shape, dimension=1)
        hm = jnp.where(lane_idx < out_dim, h, jnp.float32(-1e30))
        m = jnp.max(hm, axis=-1, keepdims=True)
        e = jnp.exp(hm - m)
        # exact reciprocal kept: approx=True does not meet the 1e-5 tolerance
        # and this op is nowhere near the bottleneck.
        h = e * pl.reciprocal(jnp.sum(e, axis=-1, keepdims=True), approx=False)
    elif final_act == "sigmoid":
        h = 1.0 / (1.0 + jnp.exp(-h))
    elif final_act == "none":
        pass
    else:
        raise ValueError(final_act)

    o_ref[...] = h.astype(o_ref.dtype)


def init_feedforward_params(key, in_dim, out_dim, hidden_dim, num_hidden_layers):
    """PyTorch-convention params: w [out, in], b [1, out], U(-1/sqrt(fan_in), ...)."""
    dims = [(in_dim, hidden_dim)]
    dims += [(hidden_dim, hidden_dim)] * num_hidden_layers
    dims += [(hidden_dim, out_dim)]
    params = []
    for (fan_in, fan_out) in dims:
        key, kw, kb = jax.random.split(key, 3)
        bound = 1.0 / jnp.sqrt(jnp.float32(fan_in))
        w = jax.random.uniform(kw, (fan_out, fan_in), jnp.float32, -bound, bound)
        b = jax.random.uniform(kb, (1, fan_out), jnp.float32, -bound, bound)
        params.append((w, b))
    return params


def prepare_padded_params(params, in_dim):
    """Transpose to [in, out] and zero-pad feature axes to multiples of 128.

    Called ONCE at init (hoisted out of the per-call path). Zero padding keeps
    the math exact: padded bias lanes are 0 -> ReLU(0)=0, and the padded input
    rows of the next weight are 0. The first layer's input width is also
    padded to 128 so x can be loaded lane-dense.
    """
    padded = []
    cur_in = _round_up(in_dim)
    for (w, b) in params:
        out_f, in_f = w.shape
        assert in_f <= cur_in
        out_p = _round_up(out_f)
        wt = w.T  # [in, out]  (transpose once here, never inside the kernel)
        wt = jnp.pad(wt, ((0, cur_in - in_f), (0, out_p - out_f)))
        bp = jnp.pad(b, ((0, 0), (0, out_p - out_f)))
        padded.append((wt, bp))
        cur_in = out_p
    return padded


@functools.partial(jax.jit, static_argnames=("out_dim", "task_type"))
def feedforward_block(x, padded_params, *, out_dim, task_type="multiclass"):
    """Fused forward pass. x: [N, in_dim] -> [N, out_dim].

    padded_params must come from prepare_padded_params (done once at init).
    """
    if task_type == "regression":
        final_act = "none"
    elif task_type == "binary":
        final_act = "sigmoid"
    elif task_type == "multiclass":
        final_act = "softmax"
    else:
        raise ValueError(task_type)

    num_layers = len(padded_params)
    in_p = padded_params[0][0].shape[0]   # padded input width (lane-dense)
    out_p = padded_params[-1][0].shape[1]  # padded output width (lane-dense)
    n, in_f = x.shape

    # Row tile: big enough to amortize the MXU weight push at large batch,
    # small enough (<=512 x 128 f32 = 256 KiB per buffer) to fit comfortably
    # in v7x's smaller VMEM with double-buffering.
    tb = min(MAX_ROW_TILE, _round_up(n, 8))
    n_pad = _round_up(n, tb)

    # Lane-dense, tile-aligned input (zero padding keeps the math exact).
    x_pad = jnp.pad(x, ((0, n_pad - n), (0, in_p - in_f)))

    flat = []
    for (w, b) in padded_params:
        flat += [w, b]

    kernel = functools.partial(
        _ffn_fused_kernel,
        num_layers=num_layers,
        out_dim=out_dim,
        final_act=final_act,
    )

    # x / out are tiled over the batch; weights/biases use a constant
    # index_map so they stay resident in VMEM across all grid steps.
    in_specs = [pl.BlockSpec((tb, in_p), lambda i: (i, 0))]
    for arr in flat:
        in_specs.append(pl.BlockSpec(arr.shape, lambda i: (0, 0)))

    # TODO(synk): dropout is treated as eval-mode identity (no RNG masking).
    y_padded = pl.pallas_call(
        kernel,
        out_shape=jax.ShapeDtypeStruct((n_pad, out_p), x.dtype),
        grid=(n_pad // tb,),
        in_specs=in_specs,
        out_specs=pl.BlockSpec((tb, out_p), lambda i: (i, 0)),
        compiler_params=pltpu.CompilerParams(
            dimension_semantics=("parallel",)),
    )(x_pad, *flat)
    return y_padded[:n, :out_dim]


def feedforward_ref(x, params, task_type="multiclass"):
    for (w, b) in params[:-1]:
        x = jnp.maximum(x @ w.T + b, 0.0)
    w, b = params[-1]
    y = x @ w.T + b
    if task_type == "multiclass":
        y = jax.nn.softmax(y, axis=1)
    elif task_type == "binary":
        y = jax.nn.sigmoid(y)
    return y


if __name__ == "__main__":
    in_dim, out_dim, hidden_dim, num_hidden_layers = 32, 4, 64, 2
    batch = 8

    key = jax.random.PRNGKey(0)
    key, kx = jax.random.split(key)
    x = jax.random.normal(kx, (batch, in_dim), jnp.float32)

    params = init_feedforward_params(key, in_dim, out_dim, hidden_dim,
                                     num_hidden_layers)
    # Hoisted out of the per-call path: transpose + pad exactly once.
    padded_params = prepare_padded_params(params, in_dim)
    padded_params = jax.tree_util.tree_map(jax.block_until_ready, padded_params)

    out = feedforward_block(x, padded_params, out_dim=out_dim,
                            task_type="multiclass")
    out = jax.block_until_ready(out)

    ref = feedforward_ref(x, params, task_type="multiclass")
    assert out.shape == (batch, out_dim)
    assert jnp.allclose(out, ref, atol=1e-5, rtol=1e-5), "mismatch vs reference"
    # rows of a softmax output must sum to 1
    assert jnp.allclose(jnp.sum(out, axis=1), jnp.ones((batch,)), atol=1e-5)

    print("KERNEL_OK")
</pallas_src>

<mosaic_0001>
module attributes {stable_mosaic.version = 11 : i64} {
  func.func @_ffn_fused_kernel(%arg0: i32, %arg1: memref<8x128xf32, #tpu.memory_space<vmem>>, %arg2: memref<128x128xf32, #tpu.memory_space<vmem>>, %arg3: memref<1x128xf32, #tpu.memory_space<vmem>>, %arg4: memref<128x128xf32, #tpu.memory_space<vmem>>, %arg5: memref<1x128xf32, #tpu.memory_space<vmem>>, %arg6: memref<128x128xf32, #tpu.memory_space<vmem>>, %arg7: memref<1x128xf32, #tpu.memory_space<vmem>>, %arg8: memref<128x128xf32, #tpu.memory_space<vmem>>, %arg9: memref<1x128xf32, #tpu.memory_space<vmem>>, %arg10: memref<8x128xf32, #tpu.memory_space<vmem>>) attributes {dimension_semantics = [#tpu.dimension_semantics<parallel>], iteration_bounds = array<i64: 1>, scalar_prefetch = 0 : i64, scratch_operands = 0 : i64, tpu.core_type = #tpu.core_type<tc>, window_params = [{transform_indices = @transform_0, window_bounds = array<i64: 8, 128>}, {pipeline_mode = #tpu.pipeline_mode<synchronous>, transform_indices = @transform_1, window_bounds = array<i64: 128, 128>}, {pipeline_mode = #tpu.pipeline_mode<synchronous>, transform_indices = @transform_2, window_bounds = array<i64: 1, 128>}, {pipeline_mode = #tpu.pipeline_mode<synchronous>, transform_indices = @transform_3, window_bounds = array<i64: 128, 128>}, {pipeline_mode = #tpu.pipeline_mode<synchronous>, transform_indices = @transform_4, window_bounds = array<i64: 1, 128>}, {pipeline_mode = #tpu.pipeline_mode<synchronous>, transform_indices = @transform_5, window_bounds = array<i64: 128, 128>}, {pipeline_mode = #tpu.pipeline_mode<synchronous>, transform_indices = @transform_6, window_bounds = array<i64: 1, 128>}, {pipeline_mode = #tpu.pipeline_mode<synchronous>, transform_indices = @transform_7, window_bounds = array<i64: 128, 128>}, {pipeline_mode = #tpu.pipeline_mode<synchronous>, transform_indices = @transform_8, window_bounds = array<i64: 1, 128>}, {transform_indices = @transform_9, window_bounds = array<i64: 8, 128>}]} {
    %c0 = arith.constant 0 : index
    %c0_0 = arith.constant 0 : index
    %0 = vector.load %arg1[%c0, %c0_0] : memref<8x128xf32, #tpu.memory_space<vmem>>, vector<8x128xf32>
    %c0_1 = arith.constant 0 : index
    %c0_2 = arith.constant 0 : index
    %1 = vector.load %arg2[%c0_1, %c0_2] : memref<128x128xf32, #tpu.memory_space<vmem>>, vector<128x128xf32>
    %c0_3 = arith.constant 0 : index
    %c0_4 = arith.constant 0 : index
    %2 = vector.load %arg3[%c0_3, %c0_4] : memref<1x128xf32, #tpu.memory_space<vmem>>, vector<1x128xf32>
    %cst = arith.constant dense<0.000000e+00> : vector<8x128xf32>
    %3 = tpu.matmul %0, %1, %cst {dimension_numbers = #tpu.dot_dimension_numbers<[1], [0], [0], [1], [0, 0, 1, 1], [], []>} : vector<8x128xf32>, vector<128x128xf32>, vector<8x128xf32> -> vector<8x128xf32>
    %4 = vector.broadcast %2 : vector<1x128xf32> to vector<8x128xf32>
    %5 = arith.addf %3, %4 : vector<8x128xf32>
    %cst_5 = arith.constant 0.000000e+00 : f32
    %6 = vector.broadcast %cst_5 : f32 to vector<8x128xf32>
    %7 = arith.maximumf %5, %6 : vector<8x128xf32>
    %c0_6 = arith.constant 0 : index
    %c0_7 = arith.constant 0 : index
    %8 = vector.load %arg4[%c0_6, %c0_7] : memref<128x128xf32, #tpu.memory_space<vmem>>, vector<128x128xf32>
    %c0_8 = arith.constant 0 : index
    %c0_9 = arith.constant 0 : index
    %9 = vector.load %arg5[%c0_8, %c0_9] : memref<1x128xf32, #tpu.memory_space<vmem>>, vector<1x128xf32>
    %cst_10 = arith.constant dense<0.000000e+00> : vector<8x128xf32>
    %10 = tpu.matmul %7, %8, %cst_10 {dimension_numbers = #tpu.dot_dimension_numbers<[1], [0], [0], [1], [0, 0, 1, 1], [], []>} : vector<8x128xf32>, vector<128x128xf32>, vector<8x128xf32> -> vector<8x128xf32>
    %11 = vector.broadcast %9 : vector<1x128xf32> to vector<8x128xf32>
    %12 = arith.addf %10, %11 : vector<8x128xf32>
    %cst_11 = arith.constant 0.000000e+00 : f32
    %13 = vector.broadcast %cst_11 : f32 to vector<8x128xf32>
    %14 = arith.maximumf %12, %13 : vector<8x128xf32>
    %c0_12 = arith.constant 0 : index
    %c0_13 = arith.constant 0 : index
    %15 = vector.load %arg6[%c0_12, %c0_13] : memref<128x128xf32, #tpu.memory_space<vmem>>, vector<128x128xf32>
    %c0_14 = arith.constant 0 : index
    %c0_15 = arith.constant 0 : index
    %16 = vector.load %arg7[%c0_14, %c0_15] : memref<1x128xf32, #tpu.memory_space<vmem>>, vector<1x128xf32>
    %cst_16 = arith.constant dense<0.000000e+00> : vector<8x128xf32>
    %17 = tpu.matmul %14, %15, %cst_16 {dimension_numbers = #tpu.dot_dimension_numbers<[1], [0], [0], [1], [0, 0, 1, 1], [], []>} : vector<8x128xf32>, vector<128x128xf32>, vector<8x128xf32> -> vector<8x128xf32>
    %18 = vector.broadcast %16 : vector<1x128xf32> to vector<8x128xf32>
    %19 = arith.addf %17, %18 : vector<8x128xf32>
    %cst_17 = arith.constant 0.000000e+00 : f32
    %20 = vector.broadcast %cst_17 : f32 to vector<8x128xf32>
    %21 = arith.maximumf %19, %20 : vector<8x128xf32>
    %c0_18 = arith.constant 0 : index
    %c0_19 = arith.constant 0 : index
    %22 = vector.load %arg8[%c0_18, %c0_19] : memref<128x128xf32, #tpu.memory_space<vmem>>, vector<128x128xf32>
    %c0_20 = arith.constant 0 : index
    %c0_21 = arith.constant 0 : index
    %23 = vector.load %arg9[%c0_20, %c0_21] : memref<1x128xf32, #tpu.memory_space<vmem>>, vector<1x128xf32>
    %cst_22 = arith.constant dense<0.000000e+00> : vector<8x128xf32>
    %24 = tpu.matmul %21, %22, %cst_22 {dimension_numbers = #tpu.dot_dimension_numbers<[1], [0], [0], [1], [0, 0, 1, 1], [], []>} : vector<8x128xf32>, vector<128x128xf32>, vector<8x128xf32> -> vector<8x128xf32>
    %25 = vector.broadcast %23 : vector<1x128xf32> to vector<8x128xf32>
    %26 = arith.addf %24, %25 : vector<8x128xf32>
    %27 = tpu.iota {dimensions = array<i32: 1>} : vector<8x128xi32>
    %c4_i32 = arith.constant 4 : i32
    %28 = vector.broadcast %c4_i32 : i32 to vector<8x128xi32>
    %29 = arith.cmpi slt, %27, %28 : vector<8x128xi32>
    %cst_23 = arith.constant -1.000000e+30 : f32
    %30 = vector.broadcast %cst_23 : f32 to vector<8x128xf32>
    %31 = arith.select %29, %26, %30 : vector<8x128xi1>, vector<8x128xf32>
    %cst_24 = arith.constant dense<0xFF800000> : vector<8xf32>
    %32 = vector.multi_reduction <maximumf>, %31, %cst_24 [1] : vector<8x128xf32> to vector<8xf32>
    %33 = vector.shape_cast %32 : vector<8xf32> to vector<8x1xf32>
    %34 = vector.broadcast %33 : vector<8x1xf32> to vector<8x128xf32>
    %35 = arith.subf %31, %34 : vector<8x128xf32>
    %36 = math.exp %35 : vector<8x128xf32>
    %cst_25 = arith.constant dense<0.000000e+00> : vector<8xf32>
    %37 = vector.multi_reduction <add>, %36, %cst_25 [1] : vector<8x128xf32> to vector<8xf32>
    %38 = vector.shape_cast %37 : vector<8xf32> to vector<8x1xf32>
    %39 = tpu.reciprocal %38 : vector<8x1xf32> -> vector<8x1xf32>
    %40 = vector.broadcast %39 : vector<8x1xf32> to vector<8x128xf32>
    %41 = arith.mulf %36, %40 : vector<8x128xf32>
    %c0_26 = arith.constant 0 : index
    %c0_27 = arith.constant 0 : index
    %42 = vector.load %arg10[%c0_26, %c0_27] : memref<8x128xf32, #tpu.memory_space<vmem>>, vector<8x128xf32>
    tpu.vector_store %arg10[%c0_26, %c0_27], %41 {strides = array<i32>} : memref<8x128xf32, #tpu.memory_space<vmem>>, vector<8x128xf32>,
    return
  }
  func.func @transform_0(%arg0: i32) -> (i32, i32) {
    %c0_i32 = arith.constant 0 : i32
    %c0_i32_0 = arith.constant 0 : i32
    return %arg0, %c0_i32 : i32, i32
  }
  func.func @transform_1(%arg0: i32) -> (i32, i32) {
    %c0_i32 = arith.constant 0 : i32
    %c0_i32_0 = arith.constant 0 : i32
    %c0_i32_1 = arith.constant 0 : i32
    return %c0_i32, %c0_i32_0 : i32, i32
  }
  func.func @transform_2(%arg0: i32) -> (i32, i32) {
    %c0_i32 = arith.constant 0 : i32
    %c0_i32_0 = arith.constant 0 : i32
    %c0_i32_1 = arith.constant 0 : i32
    return %c0_i32, %c0_i32_0 : i32, i32
  }
  func.func @transform_3(%arg0: i32) -> (i32, i32) {
    %c0_i32 = arith.constant 0 : i32
    %c0_i32_0 = arith.constant 0 : i32
    %c0_i32_1 = arith.constant 0 : i32
    return %c0_i32, %c0_i32_0 : i32, i32
  }
  func.func @transform_4(%arg0: i32) -> (i32, i32) {
    %c0_i32 = arith.constant 0 : i32
    %c0_i32_0 = arith.constant 0 : i32
    %c0_i32_1 = arith.constant 0 : i32
    return %c0_i32, %c0_i32_0 : i32, i32
  }
  func.func @transform_5(%arg0: i32) -> (i32, i32) {
    %c0_i32 = arith.constant 0 : i32
    %c0_i32_0 = arith.constant 0 : i32
    %c0_i32_1 = arith.constant 0 : i32
    return %c0_i32, %c0_i32_0 : i32, i32
  }
  func.func @transform_6(%arg0: i32) -> (i32, i32) {
    %c0_i32 = arith.constant 0 : i32
    %c0_i32_0 = arith.constant 0 : i32
    %c0_i32_1 = arith.constant 0 : i32
    return %c0_i32, %c0_i32_0 : i32, i32
  }
  func.func @transform_7(%arg0: i32) -> (i32, i32) {
    %c0_i32 = arith.constant 0 : i32
    %c0_i32_0 = arith.constant 0 : i32
    %c0_i32_1 = arith.constant 0 : i32
    return %c0_i32, %c0_i32_0 : i32, i32
  }
  func.func @transform_8(%arg0: i32) -> (i32, i32) {
    %c0_i32 = arith.constant 0 : i32
    %c0_i32_0 = arith.constant 0 : i32
    %c0_i32_1 = arith.constant 0 : i32
    return %c0_i32, %c0_i32_0 : i32, i32
  }
  func.func @transform_9(%arg0: i32) -> (i32, i32) {
    %c0_i32 = arith.constant 0 : i32
    %c0_i32_0 = arith.constant 0 : i32
    return %arg0, %c0_i32 : i32, i32
  }
}

</mosaic_0001>

<bundles_post_ra>
// kernel: feedforward_block.1
= control target key start
LH: loop header
LB: loop body
LE: loop exit
PB: predicated region body
PF: predicated region fallthrough
CT: control target
= control target key end

     0   :  { %14 = vsyncpa [#allocation3], 0  ;;  %s1090_s0 = inlined_call_operand.vmem [shape: f32[8,128], index: 0, kind: input, shape index: {}]   ;;  %s1091_s1 = inlined_call_operand.hbm [shape: f32[128,128], index: 1, kind: input, shape index: {}]   ;;  %s1092_s2 = inlined_call_operand.vmem [shape: f32[1,128], index: 2, kind: input, shape index: {}]   ;;  %s1093_s3 = inlined_call_operand.hbm [shape: f32[128,128], index: 3, kind: input, shape index: {}]   ;;  %s1094_s4 = inlined_call_operand.vmem [shape: f32[1,128], index: 4, kind: input, shape index: {}]   ;;  %s1095_s5 = inlined_call_operand.hbm [shape: f32[128,128], index: 5, kind: input, shape index: {}]   ;;  %s1096_s6 = inlined_call_operand.vmem [shape: f32[1,128], index: 6, kind: input, shape index: {}]   ;;  %s1097_s7 = inlined_call_operand.hbm [shape: f32[128,128], index: 7, kind: input, shape index: {}]   ;;  %s1098_s8 = inlined_call_operand.vmem [shape: f32[1,128], index: 8, kind: input, shape index: {}]   ;;  %s1099_s9 = inlined_call_operand.vmem [shape: f32[8,128], index: 9, kind: output, shape index: {}]  }
   0x1   :  { %15 = vsyncpa [#allocation5], 0 }
   0x2   :  { %16 = vsyncpa [#allocation8], 0  ;;  %s899_s30 = smov [#allocation4]   ;;  %s900_s11 = smov [#allocation2]  }
   0x3   :  { %s38_s10 = sshll.u32 %s899_s30, 4  ;;  %s24_s12 = sshll.u32 %s900_s11, 4  ;;  %s39_s10 = int_to_ptr.vmem [resolvable:$true] %s38_s10  ;;  %s958_s12 = int_to_ptr.vmem [resolvable:$true] %s24_s12 }
   0x4   :  { %s805_s15 = scalar_lea.hbm %s1093_s3, 2048 }
   0x5   :  { %p806_p0 = scmp.ne.s32.totalorder %s1093_s3, %s805_s15  ;;  %p809_p1 = scmp.lt.u32.totalorder %s805_s15, %s1093_s3 }
   0x7   :  { %p811_p2 = pnand %p809_p1, %p806_p0 }
   0x9   :  { %814 = shalt.err (!%p811_p2)
}
   0xa   :  { %s815_s20 = scalar_lea.vmem %s39_s10, 2048  ;;  %p820_p4 = scmp.lt.s32.totalorder %s39_s10, %s39_s10 }
   0xb   :  { %p816_p3 = scmp.ne.s32.totalorder %s39_s10, %s815_s20  ;;  %p821_p5 = scmp.lt.s32.totalorder %s815_s20, %s815_s20 }
   0xd   :  { %p822_p6 = por %p821_p5, %p820_p4 }
   0xf   :  { %p823_p7 = pnand %p822_p6, %p816_p3 }
  0x11   :  { %826 = shalt.err (!%p823_p7)
}
  0x12   :  { %s901_s21 = smov 128   ;;  %s902_s22 = smov 8  }
  0x13   :  { %44 = dma.hbm_to_vmem [thread:$0]  %s1093_s3, 2048, %s39_s10, [#allocation5], %s901_s21, %s901_s21, %s902_s22  }
  0x14   :  { %s827_s27 = scalar_lea.hbm %s1091_s1, 2048 }
  0x15   :  { %p828_p8 = scmp.ne.s32.totalorder %s1091_s1, %s827_s27  ;;  %p831_p9 = scmp.lt.u32.totalorder %s827_s27, %s1091_s1 }
  0x17   :  { %p833_p10 = pnand %p831_p9, %p828_p8 }
  0x19   :  { %836 = shalt.err (!%p833_p10)
}
  0x1a   :  { %s837_s13 = scalar_lea.vmem %s958_s12, 2048  ;;  %p842_p12 = scmp.lt.s32.totalorder %s958_s12, %s958_s12 }
  0x1b   :  { %p838_p11 = scmp.ne.s32.totalorder %s958_s12, %s837_s13  ;;  %p843_p13 = scmp.lt.s32.totalorder %s837_s13, %s837_s13 }
  0x1d   :  { %p844_p0 = por %p843_p13, %p842_p12 }
  0x1f   :  { %p845_p1 = pnand %p844_p0, %p838_p11 }
  0x21   :  { %848 = shalt.err (!%p845_p1)
}
  0x22   :  { %30 = dma.hbm_to_vmem [thread:$0]  %s1091_s1, 2048, %s958_s12, [#allocation3], %s901_s21, %s901_s21, %s902_s22  }
  0x23   :  { %s903_s14 = smov [#allocation6]   ;;  %s904_s16 = smov [#allocation7]  }
  0x24   :  { %s52_s15 = sshll.u32 %s903_s14, 4  ;;  %s66_s17 = sshll.u32 %s904_s16, 4  ;;  %s53_s15 = int_to_ptr.vmem [resolvable:$true] %s52_s15  ;;  %s995_s17 = int_to_ptr.vmem [resolvable:$true] %s66_s17 }
  0x25   :  { %s849_s20 = scalar_lea.hbm %s1095_s5, 2048 }
  0x26   :  { %p850_p2 = scmp.ne.s32.totalorder %s1095_s5, %s849_s20  ;;  %p853_p3 = scmp.lt.u32.totalorder %s849_s20, %s1095_s5 }
  0x28   :  { %p855_p4 = pnand %p853_p3, %p850_p2 }
  0x2a   :  { %858 = shalt.err (!%p855_p4)
}
  0x2b   :  { %s859_s1 = scalar_lea.vmem %s53_s15, 2048  ;;  %p864_p6 = scmp.lt.s32.totalorder %s53_s15, %s53_s15 }
  0x2c   :  { %p860_p5 = scmp.ne.s32.totalorder %s53_s15, %s859_s1  ;;  %p865_p7 = scmp.lt.s32.totalorder %s859_s1, %s859_s1 }
  0x2e   :  { %p866_p8 = por %p865_p7, %p864_p6 }
  0x30   :  { %p867_p9 = pnand %p866_p8, %p860_p5 }
  0x32   :  { %870 = shalt.err (!%p867_p9)
}
  0x33   :  { %58 = dma.hbm_to_vmem [thread:$0]  %s1095_s5, 2048, %s53_s15, [#allocation5], %s901_s21, %s901_s21, %s902_s22  }
  0x34   :  { %s871_s30 = scalar_lea.hbm %s1097_s7, 2048 }
  0x35   :  { %p872_p10 = scmp.ne.s32.totalorder %s1097_s7, %s871_s30  ;;  %p875_p11 = scmp.lt.u32.totalorder %s871_s30, %s1097_s7 }
  0x37   :  { %p877_p12 = pnand %p875_p11, %p872_p10 }
  0x39   :  { %880 = shalt.err (!%p877_p12)
}
  0x3a   :  { %s881_s14 = scalar_lea.vmem %s995_s17, 2048  ;;  %p886_p0 = scmp.lt.s32.totalorder %s995_s17, %s995_s17 }
  0x3b   :  { %p882_p13 = scmp.ne.s32.totalorder %s995_s17, %s881_s14  ;;  %p887_p1 = scmp.lt.s32.totalorder %s881_s14, %s881_s14 }
  0x3d   :  { %p888_p2 = por %p887_p1, %p886_p0 }
  0x3f   :  { %p889_p3 = pnand %p888_p2, %p882_p13 }
  0x41   :  { %892 = shalt.err (!%p889_p3)
}
  0x42   :  { %72 = dma.hbm_to_vmem [thread:$0]  %s1097_s7, 2048, %s995_s17, [#allocation8], %s901_s21, %s901_s21, %s902_s22  }
  0x43   :  { %893 = dma.done.wait [#allocation3], 2048  }
  0x44   :  { %894 = vsyncadd [#allocation3], 4294965248 }
  0x45   :  { %895 = dma.done.wait [#allocation5], 4096  }
  0x46   :  { %896 = vsyncadd [#allocation5], 4294963200 }
  0x47   :  { %897 = dma.done.wait [#allocation8], 2048  }
  0x48   :  { %898 = vsyncadd [#allocation8], 4294965248  ;;  %v905_v0 = vmov 0.0|0.0   ;;  %vm906_vm0 = vmmov 0   ;;  %v907_v1 = vmov 0.0   ;;  %v88_v2 = vld [vmem:[#allocation2] sm:$0xff] }
  0x49   :  { %696 = vmatprep.subr.bf16.mxu0 %v905_v0  ;;  %588 = vmatprep.mubr.msk.f32.mxu0 %vm906_vm0, %v907_v1  ;;  %v89_v3 = vld [vmem:[#allocation2 + $0x8] sm:$0xff]  ;;  %v90_v4 = vld [vmem:[#allocation2 + $0x10] sm:$0xff]  ;;  %v91_v6 = vld [vmem:[#allocation2 + $0x18] sm:$0xff] }
  0x4a   :  { %720 = vmatprep.subr.bf16.mxu1 %v905_v0  ;;  %623 = vmatprep.mubr.msk.f32.mxu1 %vm906_vm0, %v907_v1  ;;  %v697_v5 = vpack.c.bf16 %v89_v3, %v88_v2  ;;  %v700_v7 = vpack.c.bf16 %v91_v6, %v90_v4  ;;  %v92_v8 = vld [vmem:[#allocation2 + $0x20] sm:$0xff]  ;;  %v93_v9 = vld [vmem:[#allocation2 + $0x28] sm:$0xff]  ;;  %v184_v12 = vld [vmem:[#allocation4 + $0x10] sm:$0xff] }
  0x4b   :  { %v182_v10 = vld [vmem:[#allocation4] sm:$0xff]  ;;  %v183_v11 = vld [vmem:[#allocation4 + $0x8] sm:$0xff]  ;;  %v185_v13 = vld [vmem:[#allocation4 + $0x18] sm:$0xff]  ;;  %v703_v14 = vpack.c.bf16 %v93_v9, %v92_v8 }
  0x4c   :  { %698 = vmatpush3.bf16.msra.mxu0 %v697_v5  ;;  %v721_v15 = vpack.c.bf16 %v183_v11, %v182_v10  ;;  %v94_v16 = vld [vmem:[#allocation2 + $0x30] sm:$0xff]  ;;  %v95_v17 = vld [vmem:[#allocation2 + $0x38] sm:$0xff]  ;;  %v724_v18 = vpack.c.bf16 %v185_v13, %v184_v12  ;;  %v186_v19 = vld [vmem:[#allocation4 + $0x20] sm:$0xff] }
  0x4d   :  { %699 = vmatprep.subr.bf16.mxu0 %v905_v0  ;;  %v187_v20 = vld [vmem:[#allocation4 + $0x28] sm:$0xff]  ;;  %v706_v21 = vpack.c.bf16 %v95_v17, %v94_v16  ;;  %v96_v22 = vld [vmem:[#allocation2 + $0x40] sm:$0xff]  ;;  %v188_v25 = vld [vmem:[#allocation4 + $0x30] sm:$0xff] }
  0x4e   :  { %722 = vmatpush3.bf16.msra.mxu1 %v721_v15  ;;  %v97_v23 = vld [vmem:[#allocation2 + $0x48] sm:$0xff]  ;;  %v727_v24 = vpack.c.bf16 %v187_v20, %v186_v19  ;;  %v189_v26 = vld [vmem:[#allocation4 + $0x38] sm:$0xff]  ;;  %v98_v28 = vld [vmem:[#allocation2 + $0x50] sm:$0xff] }
  0x4f   :  { %723 = vmatprep.subr.bf16.mxu1 %v905_v0  ;;  %v709_v27 = vpack.c.bf16 %v97_v23, %v96_v22  ;;  %v99_v29 = vld [vmem:[#allocation2 + $0x58] sm:$0xff]  ;;  %v730_v30 = vpack.c.bf16 %v189_v26, %v188_v25  ;;  %v190_v31 = vld [vmem:[#allocation4 + $0x40] sm:$0xff]  ;;  %v191_v32 = vld [vmem:[#allocation4 + $0x48] sm:$0xff] }
  0x50   :  { %701 = vmatpush3.bf16.msra.mxu0 %v700_v7  ;;  %v712_v33 = vpack.c.bf16 %v99_v29, %v98_v28  ;;  %v100_v34 = vld [vmem:[#allocation2 + $0x60] sm:$0xff]  ;;  %v101_v35 = vld [vmem:[#allocation2 + $0x68] sm:$0xff]  ;;  %v733_v36 = vpack.c.bf16 %v191_v32, %v190_v31  ;;  %v192_v37 = vld [vmem:[#allocation4 + $0x50] sm:$0xff] }
  0x51   :  { %702 = vmatprep.subr.bf16.mxu0 %v905_v0  ;;  %v193_v38 = vld [vmem:[#allocation4 + $0x58] sm:$0xff]  ;;  %v715_v39 = vpack.c.bf16 %v101_v35, %v100_v34  ;;  %v102_v40 = vld [vmem:[#allocation2 + $0x70] sm:$0xff]  ;;  %v194_v43 = vld [vmem:[#allocation4 + $0x60] sm:$0xff] }
  0x52   :  { %725 = vmatpush3.bf16.msra.mxu1 %v724_v18  ;;  %v103_v41 = vld [vmem:[#allocation2 + $0x78] sm:$0xff]  ;;  %v736_v42 = vpack.c.bf16 %v193_v38, %v192_v37  ;;  %v195_v44 = vld [vmem:[#allocation4 + $0x68] sm:$0xff]  ;;  %v87_v47 = vld [vmem:[%s1090_s0] sm:$0xff] }
  0x53   :  { %726 = vmatprep.subr.bf16.mxu1 %v905_v0  ;;  %v718_v45 = vpack.c.bf16 %v103_v41, %v102_v40  ;;  %v739_v46 = vpack.c.bf16 %v195_v44, %v194_v43  ;;  %v196_v48 = vld [vmem:[#allocation4 + $0x70] sm:$0xff]  ;;  %v197_v49 = vld [vmem:[#allocation4 + $0x78] sm:$0xff]  ;;  %v276_v51 = vld [vmem:[#allocation6] sm:$0xff] }
  0x54   :  { %704 = vmatpush3.bf16.msra.mxu0 %v703_v14  ;;  %v742_v50 = vpack.c.bf16 %v197_v49, %v196_v48  ;;  %v277_v52 = vld [vmem:[#allocation6 + $0x8] sm:$0xff]  ;;  %v278_v53 = vld [vmem:[#allocation6 + $0x10] sm:$0xff]  ;;  %v279_v55 = vld [vmem:[#allocation6 + $0x18] sm:$0xff] }
  0x55   :  { %705 = vmatprep.subr.bf16.mxu0 %v905_v0  ;;  %v745_v54 = vpack.c.bf16 %v277_v52, %v276_v51  ;;  %v748_v56 = vpack.c.bf16 %v279_v55, %v278_v53  ;;  %v280_v57 = vld [vmem:[#allocation6 + $0x20] sm:$0xff]  ;;  %v281_v58 = vld [vmem:[#allocation6 + $0x28] sm:$0xff]  ;;  %v282_v60 = vld [vmem:[#allocation6 + $0x30] sm:$0xff] }
  0x56   :  { %728 = vmatpush3.bf16.msra.mxu1 %v727_v24  ;;  %v751_v59 = vpack.c.bf16 %v281_v58, %v280_v57  ;;  %v283_v61 = vld [vmem:[#allocation6 + $0x38] sm:$0xff]  ;;  %v284_v63 = vld [vmem:[#allocation6 + $0x40] sm:$0xff]  ;;  %v285_v2 = vld [vmem:[#allocation6 + $0x48] sm:$0xff] }
  0x57   :  { %729 = vmatprep.subr.bf16.mxu1 %v905_v0  ;;  %v754_v62 = vpack.c.bf16 %v283_v61, %v282_v60  ;;  %v757_v3 = vpack.c.bf16 %v285_v2, %v284_v63  ;;  %v286_v4 = vld [vmem:[#allocation6 + $0x50] sm:$0xff]  ;;  %v287_v5 = vld [vmem:[#allocation6 + $0x58] sm:$0xff]  ;;  %v288_v7 = vld [vmem:[#allocation6 + $0x60] sm:$0xff] }
  0x58   :  { %707 = vmatpush3.bf16.msra.mxu0 %v706_v21  ;;  %v760_v6 = vpack.c.bf16 %v287_v5, %v286_v4  ;;  %v289_v8 = vld [vmem:[#allocation6 + $0x68] sm:$0xff]  ;;  %v484_v10 = vld [vmem:[%s1092_s2] ss:$0 sm:$0xff]  ;;  %v290_v15 = vld [vmem:[#allocation6 + $0x70] sm:$0xff] }
  0x59   :  { %708 = vmatprep.subr.bf16.mxu0 %v905_v0  ;;  %v763_v9 = vpack.c.bf16 %v289_v8, %v288_v7  ;;  %v291_v16 = vld [vmem:[#allocation6 + $0x78] sm:$0xff]  ;;  %v370_v18 = vld [vmem:[#allocation7] sm:$0xff]  ;;  %v371_v19 = vld [vmem:[#allocation7 + $0x8] sm:$0xff] }
  0x5a   :  { %731 = vmatpush3.bf16.msra.mxu1 %v730_v30  ;;  %v766_v17 = vpack.c.bf16 %v291_v16, %v290_v15  ;;  %v372_v20 = vld [vmem:[#allocation7 + $0x10] sm:$0xff]  ;;  %v769_v21 = vpack.c.bf16 %v371_v19, %v370_v18  ;;  %v373_v22 = vld [vmem:[#allocation7 + $0x18] sm:$0xff]  ;;  %v374_v24 = vld [vmem:[#allocation7 + $0x20] sm:$0xff] }
  0x5b   :  { %732 = vmatprep.subr.bf16.mxu1 %v905_v0  ;;  %v772_v23 = vpack.c.bf16 %v373_v22, %v372_v20  ;;  %v375_v25 = vld [vmem:[#allocation7 + $0x28] sm:$0xff]  ;;  %v378_v29 = vld [vmem:[#allocation7 + $0x40] sm:$0xff]  ;;  %v380_v32 = vld [vmem:[#allocation7 + $0x50] sm:$0xff] }
  0x5c   :  { %710 = vmatpush3.bf16.msra.mxu0 %v709_v27  ;;  %v775_v26 = vpack.c.bf16 %v375_v25, %v374_v24  ;;  %v377_v27 = vld [vmem:[#allocation7 + $0x38] sm:$0xff]  ;;  %v379_v30 = vld [vmem:[#allocation7 + $0x48] sm:$0xff]  ;;  %v382_v35 = vld [vmem:[#allocation7 + $0x60] sm:$0xff] }
  0x5d   :  { %711 = vmatprep.subr.bf16.mxu0 %v905_v0  ;;  %v781_v31 = vpack.c.bf16 %v379_v30, %v378_v29  ;;  %v485_v38 = vld [vmem:[%s1094_s4] ss:$0 sm:$0xff]  ;;  %v384_v43 = vld [vmem:[#allocation7 + $0x70] sm:$0xff]  ;;  %v385_v44 = vld [vmem:[#allocation7 + $0x78] sm:$0xff] }
  0x5e   :  { %734 = vmatpush3.bf16.msra.mxu1 %v733_v36  ;;  %v383_v36 = vld [vmem:[#allocation7 + $0x68] sm:$0xff]  ;;  %v487_v52 = vld [vmem:[%s1098_s8] ss:$0 sm:$0xff] }
  0x5f   :  { %735 = vmatprep.subr.bf16.mxu1 %v905_v0  ;;  %v787_v37 = vpack.c.bf16 %v383_v36, %v382_v35 }
  0x60   :  { %713 = vmatpush3.bf16.msra.mxu0 %v712_v33  ;;  %v381_v33 = vld [vmem:[#allocation7 + $0x58] sm:$0xff] }
  0x61   :  { %714 = vmatprep.subr.bf16.mxu0 %v905_v0  ;;  %v784_v34 = vpack.c.bf16 %v381_v33, %v380_v32 }
  0x62   :  { %737 = vmatpush3.bf16.msra.mxu1 %v736_v42 }
  0x63   :  { %738 = vmatprep.subr.bf16.mxu1 %v905_v0 }
  0x64   :  { %716 = vmatpush3.bf16.msra.mxu0 %v715_v39 }
  0x65   :  { %717 = vmatprep.subr.bf16.mxu0 %v905_v0 }
  0x66   :  { %740 = vmatpush3.bf16.msra.mxu1 %v739_v46  ;;  %v486_v46 = vld [vmem:[%s1096_s6] ss:$0 sm:$0xff] }
  0x67   :  { %741 = vmatprep.subr.bf16.mxu1 %v905_v0 }
  0x68   :  { %719 = vmatpush3.bf16.msra.mxu0 %v718_v45  ;;  %v790_v45 = vpack.c.bf16 %v385_v44, %v384_v43 }
  0x69   :  { %744 = vmatprep.subr.bf16.mxu0 %v905_v0 }
  0x6a   :  { %743 = vmatpush3.bf16.msra.mxu1 %v742_v50  ;;  %v463_v50 = vlaneseq }
  0x6b   :  { %589 = vmatmul.mubr.f32.vlgmr.msra.gmra.mrb[0].mxu0 %v87_v47  ;;  %768 = vmatprep.subr.bf16.mxu1 %v905_v0 }
  0x6c   :  { %658 = vmatprep.mubr.msk.f32.mxu0 %vm906_vm0, %v907_v1  ;;  %746 = vmatpush3.bf16.msra.mxu0 %v745_v54  ;;  %v464_v51 = vand.u32 127, %v463_v50 }
  0x6d   :  { %747 = vmatprep.subr.bf16.mxu0 %v905_v0 }
  0x6e   :  { %vm465_vm1 = vcmp.lt.s32.totalorder %v464_v51, 4 }
  0x70   :  { %749 = vmatpush3.bf16.msra.mxu0 %v748_v56 }
  0x71   :  { %750 = vmatprep.subr.bf16.mxu0 %v905_v0 }
  0x74   :  { %752 = vmatpush3.bf16.msra.mxu0 %v751_v59 }
  0x75   :  { %753 = vmatprep.subr.bf16.mxu0 %v905_v0 }
  0x78   :  { %755 = vmatpush3.bf16.msra.mxu0 %v754_v62 }
  0x79   :  { %756 = vmatprep.subr.bf16.mxu0 %v905_v0 }
  0x7c   :  { %758 = vmatpush3.bf16.msra.mxu0 %v757_v3 }
  0x7d   :  { %759 = vmatprep.subr.bf16.mxu0 %v905_v0 }
  0x80   :  { %761 = vmatpush3.bf16.msra.mxu0 %v760_v6 }
  0x81   :  { %762 = vmatprep.subr.bf16.mxu0 %v905_v0 }
  0x84   :  { %764 = vmatpush3.bf16.msra.mxu0 %v763_v9 }
  0x85   :  { %765 = vmatprep.subr.bf16.mxu0 %v905_v0 }
  0x88   :  { %767 = vmatpush3.bf16.msra.mxu0 %v766_v17 }
 0x13e   :  { %v177_v11 = vpop.f32.mrb[0].mxu0 }
 0x13f   :  { %v178_v12 = vadd.f32 %v484_v10, %v177_v11  ;;  %v590_v13 = vpop.f32.mrb[1].mxu0 }
 0x141   :  { %v181_v14 = vmax.f32 %v178_v12, 0.0 }
 0x143   :  { %624 = vmatmul.mubr.f32.vlgmr.msra.gmra.mrb[0].mxu1 %v181_v14 }
 0x144   :  { %693 = vmatprep.mubr.msk.f32.mxu1 %vm906_vm0, %v907_v1  ;;  %770 = vmatpush3.bf16.msra.mxu1 %v769_v21  ;;  %v376_v1 = vld [vmem:[#allocation7 + $0x30] sm:$0xff] }
 0x145   :  { %771 = vmatprep.subr.bf16.mxu1 %v905_v0  ;;  %v778_v28 = vpack.c.bf16 %v377_v27, %v376_v1 }
 0x148   :  { %773 = vmatpush3.bf16.msra.mxu1 %v772_v23 }
 0x149   :  { %774 = vmatprep.subr.bf16.mxu1 %v905_v0 }
 0x14c   :  { %776 = vmatpush3.bf16.msra.mxu1 %v775_v26 }
 0x14d   :  { %777 = vmatprep.subr.bf16.mxu1 %v905_v0 }
 0x150   :  { %779 = vmatpush3.bf16.msra.mxu1 %v778_v28 }
 0x151   :  { %780 = vmatprep.subr.bf16.mxu1 %v905_v0 }
 0x154   :  { %782 = vmatpush3.bf16.msra.mxu1 %v781_v31 }
 0x155   :  { %783 = vmatprep.subr.bf16.mxu1 %v905_v0 }
 0x158   :  { %785 = vmatpush3.bf16.msra.mxu1 %v784_v34 }
 0x159   :  { %786 = vmatprep.subr.bf16.mxu1 %v905_v0 }
 0x15c   :  { %788 = vmatpush3.bf16.msra.mxu1 %v787_v37 }
 0x15d   :  { %789 = vmatprep.subr.bf16.mxu1 %v905_v0 }
 0x160   :  { %791 = vmatpush3.bf16.msra.mxu1 %v790_v45 }
 0x216   :  { %v271_v39 = vpop.f32.mrb[0].mxu1 }
 0x217   :  { %v272_v40 = vadd.f32 %v485_v38, %v271_v39  ;;  %v625_v41 = vpop.f32.mrb[1].mxu1 }
 0x219   :  { %v275_v42 = vmax.f32 %v272_v40, 0.0 }
 0x21b   :  { %659 = vmatmul.mubr.f32.vlgmr.msra.gmra.mrb[2].mxu0 %v275_v42 }
 0x2ee   :  { %v365_v47 = vpop.f32.mrb[2].mxu0 }
 0x2ef   :  { %v366_v48 = vadd.f32 %v486_v46, %v365_v47  ;;  %v660_v0 = vpop.f32.mrb[3].mxu0 }
 0x2f1   :  { %v369_v49 = vmax.f32 %v366_v48, 0.0 }
 0x2f3   :  { %694 = vmatmul.mubr.f32.vlgmr.msra.gmra.mrb[2].mxu1 %v369_v49 }
 0x3c6   :  { %v459_v53 = vpop.f32.mrb[2].mxu1 }
 0x3c7   :  { %v460_v54 = vadd.f32 %v487_v52, %v459_v53  ;;  %v695_v55 = vpop.f32.mrb[3].mxu1 }
 0x3c9   :  { %v466_v56 = vsel %vm465_vm1, %v460_v54, -1e+30 }
 0x3ca   :  { %467 = vmax.xlane.f32.xlu0 %v466_v56 }
 0x457   :  { %v468_v57 = vpop.xlane.xlu0 %467 }
 0x458   :  { %v469_v58 = vsub.f32 %v466_v56, %v468_v57 }
 0x45a   :  { %v470_v59 = vmul.f32 1.442695, %v469_v58 }
 0x45c   :  { %801 = vpow2.f32 %v470_v59 }
 0x466   :  { %v802_v60 = vpop.eup %801 }
 0x467   :  { %472 = vadd.xlane.f32.xlu0 %v802_v60 }
 0x4f4   :  { %v473_v61 = vpop.xlane.xlu0 %472 }
 0x4f5   :  { %803 = vrcp.f32 %v473_v61 }
 0x4ff   :  { %v804_v62 = vpop.eup %803 }
 0x500   :  { %v475_v63 = vmul.f32 %v804_v62, %v802_v60 }
 0x502   :  { %476 = vst [vmem:[%s1099_s9] sm:$0xff] %v475_v63 }
 0x503   :  { %481 = vsyncpa [#allocation3], 1 }
 0x504   :  { %482 = vsyncpa [#allocation5], 1 }
 0x505   :  { %483 = vsyncpa [#allocation8], 1 }

</bundles_post_ra>
